<compile_context>
chip_gen: v7x
topology: tpu7x:2x2x1
jax: 0.10.0
libtpu: 0.0.40
codegen_flags: <defaults>
</compile_context>

<pallas_src>
import math
from functools import partial

import jax
import jax.numpy as jnp
from jax.experimental import pallas as pl
from jax.experimental.pallas import tpu as pltpu


def _choose_tile(s: int, target: int) -> int:
    """Full S when small; else largest power-of-two divisor down to target//4; else
    `target` (wrapper zero-pads S up to a multiple of it)."""
    if s <= target:
        return s
    for t in (target, target // 2, target // 4):
        if s % t == 0:
            return t
    return target


def _kv_kernel(k_ref, v_ref, a_ref, *, mxu_dtype):
    """Accumulate A = k_tile^T @ [v | 1] -> (D, Dv+1) directly into the output block."""
    f32 = jnp.float32
    k = k_ref[0].astype(mxu_dtype)        # (tk, D)
    va = v_ref[0].astype(mxu_dtype)       # (tk, Dv+1)  (ones column pre-appended in wrapper)
    part = jax.lax.dot_general(k, va, (((0,), (0,)), ((), ())),
                               preferred_element_type=f32)        # (D, Dv+1)

    @pl.when(pl.program_id(2) == 0)
    def _():
        a_ref[0, 0] = part

    @pl.when(pl.program_id(2) != 0)
    def _():
        a_ref[0, 0] += part


def _out_kernel(q_ref, m_ref, o_ref, *, approx_recip):
    """out = (q_tile @ M)[:, :Dv] / (q_tile @ M)[:, Dv]  for one (batch, q-tile)."""
    f32 = jnp.float32
    dv = o_ref.shape[-1]
    # M stays f32 (S-accumulated quantity); the dot accumulates in f32 regardless of q dtype.
    att = jnp.dot(q_ref[0], m_ref[0], preferred_element_type=f32)  # (tq, Dv+1)
    att_raw = att[:, :dv]                  # (tq, Dv)
    att_norm = att[:, dv:dv + 1]           # (tq, 1) == q' @ (k'^T @ 1)
    out = att_raw * pl.reciprocal(att_norm, approx=approx_recip)
    o_ref[0] = out.astype(o_ref.dtype)


def favor_attention_pallas(q, k, v, w, *, mxu_dtype=None, tile_s: int = 1024,
                           kv_splits=None, approx_recip: bool = False):
    """q, k: (B, S, D); v: (B, S, Dv); w: (D, F) random-feature projection."""
    B, S, D = q.shape
    Dv = v.shape[-1]
    f32 = jnp.float32
    if mxu_dtype is None:
        mxu_dtype = q.dtype  # pass bf16 q/k/v on v6e/v7x for the HBM-bandwidth win

    # softmax_temp = D**-0.25 is folded into G = (temp*W)(temp*W)^T once; the kernels never
    # see W or the F dimension (pass-1/pass-2 reassociation).
    temp = float(D) ** (-0.25)
    w32 = w.astype(f32) * jnp.asarray(temp, f32)
    G = w32 @ w32.T                                            # (D, D), f32, computed once

    # Ones column appended once here (kills the per-tile in-kernel concat/relayout).
    v_aug = jnp.concatenate([v, jnp.ones((B, S, 1), dtype=v.dtype)], axis=-1)  # (B,S,Dv+1)

    T = _choose_tile(S, tile_s)
    if kv_splits is None:
        kv_splits = 2 if B == 1 else 1          # keep both v7x TensorCores busy when B==1
    kv_splits = max(1, min(kv_splits, -(-S // T)))
    chunk = kv_splits * T
    Sp = -(-S // chunk) * chunk                 # pad S to a tile multiple (zero rows are inert)
    if Sp != S:
        padw = ((0, 0), (0, Sp - S), (0, 0))
        q = jnp.pad(q, padw)
        k = jnp.pad(k, padw)
        v_aug = jnp.pad(v_aug, padw)
    steps = Sp // chunk

    # ---- Pass 1: per-batch (per-split) A = k^T @ [v | 1]  -> (B, splits, D, Dv+1) --------
    a_parts = pl.pallas_call(
        partial(_kv_kernel, mxu_dtype=mxu_dtype),
        out_shape=jax.ShapeDtypeStruct((B, kv_splits, D, Dv + 1), f32),
        grid_spec=pltpu.PrefetchScalarGridSpec(
            num_scalar_prefetch=0,
            grid=(B, kv_splits, steps),
            in_specs=[
                pl.BlockSpec((1, T, D), lambda b, s, t: (b, s * steps + t, 0)),
                pl.BlockSpec((1, T, Dv + 1), lambda b, s, t: (b, s * steps + t, 0)),
            ],
            out_specs=pl.BlockSpec((1, 1, D, Dv + 1), lambda b, s, t: (b, s, 0, 0)),
        ),
        compiler_params=pltpu.CompilerParams(
            dimension_semantics=("parallel", "parallel", "arbitrary")),
    )(k, v_aug)

    # Apply the feature projection ONCE per batch (tiny f32 XLA matmul between the calls).
    A = a_parts.sum(axis=1)                                    # (B, D, Dv+1)
    M = jnp.einsum('de,bef->bdf', G, A)                        # (B, D, Dv+1), f32

    # ---- Pass 2: out = (q @ M)[:, :Dv] / (q @ M)[:, Dv] -----------------------------------
    out_p = pl.pallas_call(
        partial(_out_kernel, approx_recip=approx_recip),
        out_shape=jax.ShapeDtypeStruct((B, Sp, Dv), q.dtype),
        grid_spec=pltpu.PrefetchScalarGridSpec(
            num_scalar_prefetch=0,
            grid=(B, Sp // T),
            in_specs=[
                pl.BlockSpec((1, T, D), lambda b, t: (b, t, 0)),
                pl.BlockSpec((1, D, Dv + 1), lambda b, t: (b, 0, 0)),
            ],
            out_specs=pl.BlockSpec((1, T, Dv), lambda b, t: (b, t, 0)),
        ),
        compiler_params=pltpu.CompilerParams(
            dimension_semantics=("parallel", "parallel")),
    )(q, M)

    return out_p if Sp == S else out_p[:, :S, :]


def favor_attention_reference(q, k, v, w):
    """Pure-JAX reference mirroring FavorAttention.forward (non-causal)."""
    D = q.shape[-1]
    temp = float(D) ** (-0.25)
    qp = (q * temp) @ w
    kp = (k * temp) @ w
    ones = jnp.ones_like(v)
    att_norm = qp @ (jnp.swapaxes(kp, -2, -1) @ ones)
    att_raw = qp @ (jnp.swapaxes(kp, -2, -1) @ v)
    return att_raw / att_norm


if __name__ == "__main__":
    # Small shapes consistent with the module: batch=2, seq=8, head_dim=16, dim_features=32.
    B, S, D, Dv = 2, 8, 16, 16
    dim_features = 32

    key = jax.random.PRNGKey(0)
    kq, kk, kvk, kw = jax.random.split(key, 4)
    q = jax.random.normal(kq, (B, S, D), dtype=jnp.float32)
    k = jax.random.normal(kk, (B, S, D), dtype=jnp.float32)
    v = jax.random.normal(kvk, (B, S, Dv), dtype=jnp.float32)

    # SMOrf random-feature matrix: randn(ceil(D/F), F, F).flatten(0,1)[:D] -> (D, F)
    blocks = math.ceil(D / dim_features)
    H = jax.random.normal(kw, (blocks, dim_features, dim_features), dtype=jnp.float32)
    w = H.reshape(blocks * dim_features, dim_features)[:D]

    out = jax.block_until_ready(favor_attention_pallas(q, k, v, w))

    ref = favor_attention_reference(q, k, v, w)
    assert out.shape == (B, S, Dv), out.shape
    # Reassociated (mathematically identical) contraction order -> small fp差; tolerance 1e-3.
    assert jnp.allclose(out, ref, rtol=1e-3, atol=1e-3), (
        float(jnp.max(jnp.abs(out - ref)))
    )
    print("KERNEL_OK")
</pallas_src>

<mosaic_0001>
module attributes {stable_mosaic.version = 11 : i64} {
  func.func @_kv_kernel(%arg0: i32, %arg1: i32, %arg2: i32, %arg3: memref<1x8x16xf32, #tpu.memory_space<vmem>>, %arg4: memref<1x8x17xf32, #tpu.memory_space<vmem>>, %arg5: memref<1x1x16x17xf32, #tpu.memory_space<vmem>>) attributes {dimension_semantics = [#tpu.dimension_semantics<parallel>, #tpu.dimension_semantics<parallel>, #tpu.dimension_semantics<arbitrary>], iteration_bounds = array<i64: 2, 1, 1>, scalar_prefetch = 0 : i64, scratch_operands = 0 : i64, tpu.core_type = #tpu.core_type<tc>, window_params = [{transform_indices = @transform_0, window_bounds = array<i64: 1, 8, 16>}, {transform_indices = @transform_1, window_bounds = array<i64: 1, 8, 17>}, {transform_indices = @transform_2, window_bounds = array<i64: 1, 1, 16, 17>}]} {
    %c0 = arith.constant 0 : index
    %c0_0 = arith.constant 0 : index
    %c0_1 = arith.constant 0 : index
    %0 = vector.load %arg3[%c0, %c0_0, %c0_1] : memref<1x8x16xf32, #tpu.memory_space<vmem>>, vector<1x8x16xf32>
    %1 = vector.shape_cast %0 : vector<1x8x16xf32> to vector<8x16xf32>
    %c0_2 = arith.constant 0 : index
    %c0_3 = arith.constant 0 : index
    %c0_4 = arith.constant 0 : index
    %2 = vector.load %arg4[%c0_2, %c0_3, %c0_4] : memref<1x8x17xf32, #tpu.memory_space<vmem>>, vector<1x8x17xf32>
    %3 = vector.shape_cast %2 : vector<1x8x17xf32> to vector<8x17xf32>
    %cst = arith.constant dense<0.000000e+00> : vector<16x17xf32>
    %4 = tpu.matmul %1, %3, %cst {dimension_numbers = #tpu.dot_dimension_numbers<[0], [0], [1], [1], [0, 1, 1, 1], [], []>} : vector<8x16xf32>, vector<8x17xf32>, vector<16x17xf32> -> vector<16x17xf32>
    %c0_i32 = arith.constant 0 : i32
    %5 = arith.cmpi eq, %arg2, %c0_i32 : i32
    %6 = arith.extui %5 : i1 to i32
    %c0_i32_5 = arith.constant 0 : i32
    %7 = arith.cmpi ne, %6, %c0_i32_5 : i32
    scf.if %7 {
      %c0_8 = arith.constant 0 : index
      %c0_9 = arith.constant 0 : index
      %c0_10 = arith.constant 0 : index
      %c0_11 = arith.constant 0 : index
      %11 = vector.load %arg5[%c0_8, %c0_9, %c0_10, %c0_11] : memref<1x1x16x17xf32, #tpu.memory_space<vmem>>, vector<1x1x16x17xf32>
      %12 = vector.shape_cast %11 : vector<1x1x16x17xf32> to vector<16x17xf32>
      %13 = vector.shape_cast %4 : vector<16x17xf32> to vector<1x1x16x17xf32>
      tpu.vector_store %arg5[%c0_8, %c0_9, %c0_10, %c0_11], %13 {strides = array<i32>} : memref<1x1x16x17xf32, #tpu.memory_space<vmem>>, vector<1x1x16x17xf32>,
    } else {
    }
    %c0_i32_6 = arith.constant 0 : i32
    %8 = arith.cmpi ne, %arg2, %c0_i32_6 : i32
    %9 = arith.extui %8 : i1 to i32
    %c0_i32_7 = arith.constant 0 : i32
    %10 = arith.cmpi ne, %9, %c0_i32_7 : i32
    scf.if %10 {
      %c0_8 = arith.constant 0 : index
      %c0_9 = arith.constant 0 : index
      %c0_10 = arith.constant 0 : index
      %c0_11 = arith.constant 0 : index
      %11 = vector.load %arg5[%c0_8, %c0_9, %c0_10, %c0_11] : memref<1x1x16x17xf32, #tpu.memory_space<vmem>>, vector<1x1x16x17xf32>
      %12 = vector.shape_cast %11 : vector<1x1x16x17xf32> to vector<16x17xf32>
      %13 = arith.addf %12, %4 : vector<16x17xf32>
      %c0_12 = arith.constant 0 : index
      %c0_13 = arith.constant 0 : index
      %c0_14 = arith.constant 0 : index
      %c0_15 = arith.constant 0 : index
      %14 = vector.load %arg5[%c0_12, %c0_13, %c0_14, %c0_15] : memref<1x1x16x17xf32, #tpu.memory_space<vmem>>, vector<1x1x16x17xf32>
      %15 = vector.shape_cast %14 : vector<1x1x16x17xf32> to vector<16x17xf32>
      %16 = vector.shape_cast %13 : vector<16x17xf32> to vector<1x1x16x17xf32>
      tpu.vector_store %arg5[%c0_12, %c0_13, %c0_14, %c0_15], %16 {strides = array<i32>} : memref<1x1x16x17xf32, #tpu.memory_space<vmem>>, vector<1x1x16x17xf32>,
    } else {
    }
    return
  }
  func.func @transform_0(%arg0: i32, %arg1: i32, %arg2: i32) -> (i32, i32, i32) {
    %c1_i32 = arith.constant 1 : i32
    %0 = arith.muli %arg1, %c1_i32 : i32
    %1 = arith.addi %0, %arg2 : i32
    %c0_i32 = arith.constant 0 : i32
    %c0_i32_0 = arith.constant 0 : i32
    return %arg0, %1, %c0_i32 : i32, i32, i32
  }
  func.func @transform_1(%arg0: i32, %arg1: i32, %arg2: i32) -> (i32, i32, i32) {
    %c1_i32 = arith.constant 1 : i32
    %0 = arith.muli %arg1, %c1_i32 : i32
    %1 = arith.addi %0, %arg2 : i32
    %c0_i32 = arith.constant 0 : i32
    %c0_i32_0 = arith.constant 0 : i32
    return %arg0, %1, %c0_i32 : i32, i32, i32
  }
  func.func @transform_2(%arg0: i32, %arg1: i32, %arg2: i32) -> (i32, i32, i32, i32) {
    %c0_i32 = arith.constant 0 : i32
    %c0_i32_0 = arith.constant 0 : i32
    %c0_i32_1 = arith.constant 0 : i32
    return %arg0, %arg1, %c0_i32, %c0_i32_0 : i32, i32, i32, i32
  }
}

</mosaic_0001>

<bundles_post_ra>
// kernel: tpu_custom_call.1
= control target key start
LH: loop header
LB: loop body
LE: loop exit
PB: predicated region body
PF: predicated region fallthrough
CT: control target
= control target key end

     0   :  { %7 = vsyncpa [#allocation3], 0  ;;  %s984_s0 = inlined_call_operand.hbm [shape: f32[2,8,16], index: 0, kind: input, shape index: {}]   ;;  %s985_s1 = inlined_call_operand.hbm [shape: f32[2,8,17], index: 1, kind: input, shape index: {}]   ;;  %s986_s2 = inlined_call_operand.hbm [shape: f32[2,1,16,17], index: 2, kind: output, shape index: {}]  }
   0x1   :  { %9 = vsyncpa [#allocation3 + $0x1], 0 }
   0x2   :  { %10 = vsyncpa [#allocation6], 0 }
   0x3   :  { %12 = vsyncpa [#allocation6 + $0x1], 0 }
   0x4   :  { %13 = vsyncpa [#allocation4], 0 }
   0x5   :  { %15 = vsyncpa [#allocation4 + $0x1], 0  ;;  %s761_s9 = smov 0   ;;  %s763_s10 = smov 0  }
   0x6   :  { %s765_s11 = smov 0   ;;  %s767_s12 = smov 0  }
   0x7   :  { %s769_s13 = smov 0   ;;  %s771_s14 = smov 0  }
   0x8 LB: > { %s495_s15 = sadd.s32 4294967295, %s739_s14   ;;  %s496_s16 = sadd.s32 4294967294, %s739_s14   ;;  %s739_s14 = sphi %s771_s14, %s21_s14   ;;  %s735_s13 = sphi %s769_s13, %s1006_s13   ;;  %s731_s12 = sphi %s767_s12, %s1005_s12   ;;  %s727_s11 = sphi %s765_s11, %s1004_s11   ;;  %s723_s10 = sphi %s763_s10, %s1003_s10   ;;  %s719_s9 = sphi %s761_s9, %s1002_s9  }
   0x9   : > { %s40_s17 = sadd.s32 1, %s735_s13  ;;  %s51_s18 = sadd.s32 1, %s727_s11 }
   0xa   : > { %p42_p0 = scmp.ge.s32.totalorder %s40_s17, 2  ;;  %p58_p1 = scmp.ne.s32.totalorder %s727_s11, %s723_s10 }
   0xb   : > { %p59_p2 = scmp.eq.s32.totalorder %s739_s14, 0  ;;  %p64_p3 = scmp.ne.s32.totalorder %s723_s10, %s719_s9 }
   0xc   : > { %s1008_s17 = smov (%p42_p0, %s40_s17), 0  ;;  %p65_p5 = scmp.eq.s32.totalorder %s495_s15, 0 }
   0xd   : > { %p802_p4 = por %p59_p2, %p58_p1  ;;  %s46_s20 = ssub.s32 %s735_s13, %s1008_s17 }
   0xe   : > { %p120_p6 = scmp.eq.s32.totalorder %s495_s15, 1  ;;  %p49_p7 = scmp.eq.s32.totalorder %s46_s20, 0 }
   0xf   : > { %p808_p8 = por %p65_p5, %p64_p3  ;;  %p126_p10 = scmp.eq.s32.totalorder %s496_s16, 1 }
  0x10   : > { %p812_p9 = por %p120_p6, %p58_p1  ;;  %p540_p13 = scmp.lt.s32.totalorder %s739_s14, 2 }
  0x11   : > { %s990_s21 = scalar_select %p808_p8, 1, 0 }
  0x12   : > { %s991_s22 = scalar_select %p812_p9, 1, 0 }
  0x13   : > { %s817_s23 = scalar_select %p49_p7, %s727_s11, %s51_s18  }
  0x14   : > { %p819_p11 = por %p126_p10, %p64_p3  ;;  %s826_s25 = sand.u32 1, %s727_s11  }
  0x15   : > { %s499_s26 = sshll.u32 %s826_s25, 3  ;;  %s500_s27 = sshll.u32 %s735_s13, 7 }
  0x16   : > { %s992_s24 = scalar_select %p819_p11, 1, 0 }
  0x17   : > { %s835_s30 = scalar_lea.hbm %s984_s0, %s500_s27  ;;  %s150_s3 = scalar_lea.vmem [#allocation2], %s499_s26 }
  0x18   : > { %s159_s4 = sshll.u32 %s150_s3, 4  ;;  %p843_p0 = pnand %p540_p13, %p802_p4  ;;  %s839_s4 = int_to_ptr.vmem [resolvable:$true] %s159_s4 }
  0x19   : > { %s147_s6 = scalar_lea.sflag [#allocation3], %s826_s25  ;;  %s593_s7 = scalar_lea.hbm %s835_s30, 128 }
  0x1a   : > { %p594_p3 = scmp.ne.s32.totalorder %s835_s30, %s593_s7  ;;  %p595_p5 = pneg %p843_p0 }
  0x1b   : > { %s598_s16 = scalar_lea.hbm %s984_s0, 256  ;;  %p599_p4 = scmp.lt.u32.totalorder %s835_s30, %s984_s0 }
  0x1c   : > { %p596_p6 = pnand %p595_p5, %p594_p3  ;;  %p600_p10 = scmp.lt.u32.totalorder %s598_s16, %s593_s7 }
  0x1d   : > { %p602_p12 = scmp.lt.u32.totalorder %s593_s7, %s835_s30 }
  0x1e   : > { %p597_p7 = pneg %p596_p6  ;;  %p601_p13 = por %p600_p10, %p599_p4 }
  0x20   : > { %p603_p1 = por %p602_p12, %p601_p13 }
  0x22   : > { %p604_p2 = pnand %p603_p1, %p597_p7 }
  0x24   : > { %607 = shalt.err (!%p604_p2)
}
  0x25   : > { %s608_s20 = scalar_lea.vmem %s839_s4, 128  ;;  %s741_s28 = smov [#allocation2]  }
  0x26   : > { %p609_p3 = scmp.ne.s32.totalorder %s839_s4, %s608_s20  ;;  %s613_s29 = sshll.u32 %s741_s28, 4  ;;  %s614_s29 = int_to_ptr.vmem [resolvable:$false] %s613_s29 }
  0x27   : > { %s615_s3 = scalar_lea.vmem %s614_s29, 256  ;;  %p616_p9 = scmp.lt.s32.totalorder %s839_s4, %s614_s29 }
  0x28   : > { %p611_p6 = pnand %p609_p3, %p595_p5  ;;  %p617_p4 = scmp.lt.s32.totalorder %s615_s3, %s608_s20 }
  0x2a   : > { %p612_p11 = pneg %p611_p6  ;;  %p618_p10 = por %p617_p4, %p616_p9 }
  0x2c   : > { %p619_p12 = pnand %p618_p10, %p612_p11 }
  0x2e   : > { %622 = shalt.err (!%p619_p12)
}
  0x2f   : > { %532 = dma.hbm_to_vmem [thread:$0]  (!%p843_p0), %s835_s30, 128, %s839_s4, %s147_s6  }
  0x30   : > { %p994_p1 = scmp.lt.s32.totalorder %s739_s14, 3  ;;  %p995_p2 = scmp.ge.s32.totalorder %s739_s14, 1 }
  0x31   : > { %s888_s16 = scalar_lea.hbm %s985_s1, %s500_s27  ;;  %s170_s18 = scalar_lea.vmem [#allocation5], %s499_s26 }
  0x32   : > { %p879_p7 = pnand %p995_p2, %p994_p1  ;;  %s179_s19 = sshll.u32 %s170_s18, 4  ;;  %s180_s19 = int_to_ptr.vmem [resolvable:$true] %s179_s19 }
  0x33   : > { %s167_s30 = scalar_lea.sflag [#allocation6], %s826_s25  ;;  %s623_s4 = scalar_lea.hbm %s888_s16, 128 }
  0x34   : > { %s996_s7 = scalar_select %p879_p7, 1, 0 }
  0x35   : > { %p624_p9 = scmp.ne.s32.totalorder %s888_s16, %s623_s4  ;;  %s628_s27 = scalar_lea.hbm %s985_s1, 256 }
  0x36   : > { %p629_p3 = scmp.lt.u32.totalorder %s888_s16, %s985_s1  ;;  %p630_p6 = scmp.lt.u32.totalorder %s628_s27, %s623_s4 }
  0x37   : > { %p626_p11 = pnand %p624_p9, %p595_p5  ;;  %p632_p10 = scmp.lt.u32.totalorder %s623_s4, %s888_s16 }
  0x38   : > { %p631_p4 = por %p630_p6, %p629_p3 }
  0x39   : > { %p627_p13 = pneg %p626_p11 }
  0x3a   : > { %p633_p12 = por %p632_p10, %p631_p4 }
  0x3c   : > { %p634_p1 = pnand %p633_p12, %p627_p13 }
  0x3e   : > { %637 = shalt.err (!%p634_p1)
}
  0x3f   : > { %s638_s25 = scalar_lea.vmem %s180_s19, 128  ;;  %s742_s26 = smov [#allocation5]  }
  0x40   : > { %p639_p2 = scmp.ne.s32.totalorder %s180_s19, %s638_s25  ;;  %s643_s3 = sshll.u32 %s742_s26, 4  ;;  %s644_s3 = int_to_ptr.vmem [resolvable:$false] %s643_s3 }
  0x41   : > { %s645_s8 = scalar_lea.vmem %s644_s3, 256  ;;  %p646_p8 = scmp.lt.s32.totalorder %s180_s19, %s644_s3 }
  0x42   : > { %p641_p9 = pnand %p639_p2, %p595_p5  ;;  %p647_p7 = scmp.lt.s32.totalorder %s645_s8, %s638_s25 }
  0x44   : > { %p642_p11 = pneg %p641_p9  ;;  %p648_p3 = por %p647_p7, %p646_p8 }
  0x46   : > { %p649_p6 = pnand %p648_p3, %p642_p11 }
  0x48   : > { %652 = shalt.err (!%p649_p6)
}
  0x49   : > { %535 = dma.hbm_to_vmem [thread:$0]  (!%p843_p0), %s888_s16, 128, %s180_s19, %s167_s30  }
  0x4a   : > { %p997_p13 = scmp.ne.s32.totalorder %s996_s7, 0 }
  0x4b   : > { %s915_s15 = sand.u32 (!%p997_p13), 1, %s723_s10   ;;  %p998_p5 = scmp.ne.s32.totalorder (!%p997_p13), %s990_s21, 0 }
  0x4c   : > { %188 = sbr.rel (%p997_p13) target bundleno = 448 (0x1c0), region = 28  ;;  %s504_s18 = sshll.u32 (!%p997_p13), %s915_s15, 3 }
  0x4d   : > { %s191_s4 = scalar_lea.sflag (!%p997_p13), [#allocation3], %s915_s15  ;;  %s194_s6 = scalar_lea.vmem (!%p997_p13), [#allocation2], %s504_s18 }
  0x53   : > { %706 = dma.done.wait (%p998_p5), %s191_s4, 128  }
  0x54   : > { %708 = vsyncadd (%p998_p5), %s191_s4, 4294967168  ;;  %s200_s5 = scalar_lea.sflag [#allocation6], %s915_s15  ;;  %s203_s16 = scalar_lea.vmem [#allocation5], %s504_s18 }
  0x55   : > { %710 = dma.done.wait (%p998_p5), %s200_s5, 128  }
  0x56   : > { %712 = vsyncadd (%p998_p5), %s200_s5, 4294967168  ;;  %v231_v0 = vld [vmem:[%s194_s6] sm:$0xff]  ;;  %v232_v1 = vld [vmem:[%s203_s16] sm:$0xff]  ;;  %vm265_vm0 = vcmask 64512   ;;  %s506_s7 = sshll.u32 %s915_s15, 4  ;;  %s514_s20 = sshll.u32 %s731_s12, 8 }
  0x57   : > { %233 = vxpose.xlu0.b32.start.end [1/1] (short) (narrow) %v231_v0, 16  ;;  %518 = vmatprep.subr.mxu0 %v232_v1  ;;  %s228_s19 = scalar_lea.vmem [#allocation7], %s506_s7  ;;  %vm351_vm1 = vcmask 138240   ;;  %s935_s28 = scalar_lea.hbm %s986_s2, %s514_s20 }
  0x58   : > { %519 = vmatpush3.msra.mxu0 %v232_v1  ;;  %s381_s30 = sshll.u32 %s228_s19, 4  ;;  %s366_s29 = scalar_lea.sflag [#allocation4], %s915_s15  ;;  %s930_s30 = int_to_ptr.vmem [resolvable:$true] %s381_s30 }
  0x59   : > { %s653_s25 = scalar_lea.vmem %s930_s30, 256  ;;  %p999_p0 = scmp.ne.s32.totalorder %s991_s22, 0 }
  0x5a   : > { %p654_p8 = scmp.ne.s32.totalorder %s930_s30, %s653_s25  ;;  %s743_s12 = smov [#allocation7]  }
  0x5b   : > { %s657_s26 = sshll.u32 %s743_s12, 4  ;;  %s658_s26 = int_to_ptr.vmem [resolvable:$false] %s657_s26 }
  0x5c   : > { %p655_p7 = pnand %p654_p8, %p999_p0  ;;  %s659_s3 = scalar_lea.vmem %s658_s26, 512 }
  0x5d   : > { %p660_p10 = scmp.lt.s32.totalorder %s930_s30, %s658_s26  ;;  %p661_p12 = scmp.lt.s32.totalorder %s659_s3, %s653_s25 }
  0x5e   : > { %p656_p4 = pneg %p655_p7 }
  0x5f   : > { %p662_p1 = por %p661_p12, %p660_p10 }
  0x61   : > { %p663_p2 = pnand %p662_p1, %p656_p4 }
  0xd7   : > { %v249_v2 = vpop.trf.xlu0 }
  0xd8   : > { %520 = vmatprep.mubr.msk.f32.mxu0 %vm265_vm0, %v249_v2 }
  0xdb   : > { %v250_v3 = vpop.trf.xlu0 }
  0xdc   : > { %521 = vmatmul.mubr.msk.f32.vlgmr.msra.gmra.mrb[0].mxu0 %vm265_vm0, %v250_v3 }
 0x1af   : > { %v522_v4 = vpop.f32.mrb[0].mxu0 }
 0x1b0   : > { %353 = vst.msk [vmem:[%s228_s19 + $0x8] sm:$0xff] %vm351_vm1, %v522_v4  ;;  %v338_v5 = vpop.f32.mrb[1].mxu0 }
 0x1b1   : > { %352 = vst.msk [vmem:[%s228_s19] sm:$0xff] %vm351_vm1, %v338_v5 }
 0x1b2   : > { %666 = shalt.err (!%p663_p2)
}
 0x1b3   : > { %s667_s8 = scalar_lea.hbm %s935_s28, 256  ;;  %s671_s6 = scalar_lea.hbm %s986_s2, 512 }
 0x1b4   : > { %p668_p9 = scmp.ne.s32.totalorder %s935_s28, %s667_s8  ;;  %p672_p6 = scmp.lt.u32.totalorder %s935_s28, %s986_s2 }
 0x1b5   : > { %p673_p13 = scmp.lt.u32.totalorder %s671_s6, %s667_s8  ;;  %p675_p8 = scmp.lt.u32.totalorder %s667_s8, %s935_s28 }
 0x1b6   : > { %p669_p11 = pnand %p668_p9, %p999_p0 }
 0x1b7   : > { %p674_p5 = por %p673_p13, %p672_p6 }
 0x1b8   : > { %p670_p3 = pneg %p669_p11 }
 0x1b9   : > { %p676_p7 = por %p675_p8, %p674_p5 }
 0x1bb   : > { %p677_p4 = pnand %p676_p7, %p670_p3 }
 0x1bd   : > { %680 = shalt.err (!%p677_p4)
}
 0x1be   : > { %s744_s7 = smov 128   ;;  %s745_s19 = smov 8  }
 0x1bf   : > { %527 = dma.vmem_to_hbm [thread:$0]  (%p999_p0), %s930_s30, 256, %s935_s28, %s366_s29, %s744_s7, %s744_s7, %s745_s19  }
 0x1c0 PF: > { %s396_s20 = sand.u32 1, %s719_s9   ;;  %p1000_p10 = scmp.ne.s32.totalorder %s992_s24, 0 }
 0x1c1   : > { %p1001_p12 = scmp.ge.s32.totalorder %s739_s14, 2  ;;  %s397_s21 = scalar_lea.sflag [#allocation4], %s396_s20 }
 0x1c3   : > { %p537_p1 = pnand %p1001_p12, %p1000_p10 }
 0x1c5   : > { %714 = dma.done.wait (!%p537_p1), %s397_s21, 256  }
 0x1c6   : > { %716 = vsyncadd (!%p537_p1), %s397_s21, 4294967040  ;;  %s21_s14 = sadd.s32 1, %s739_s14   ;;  %s1002_s9 = smov %s723_s10 }
 0x1c7   : > { %p18_p2 = scmp.ge.s32.totalorder %s21_s14, 4   ;;  %s1003_s10 = smov %s727_s11 }
 0x1c8   : > { %s1004_s11 = smov %s817_s23  ;;  %s1005_s12 = smov %s735_s13 }
 0x1c9   : > { %s1006_s13 = smov %s1008_s17  ;;  %20 = sbr.rel (!%p18_p2) target bundleno = 8 (0x8), region = 94 }
 0x1d0   :  { %402 = vsyncpa [#allocation3], 1 }
 0x1d1   :  { %404 = vsyncpa [#allocation3 + $0x1], 1 }
 0x1d2   :  { %405 = vsyncpa [#allocation6], 1 }
 0x1d3   :  { %407 = vsyncpa [#allocation6 + $0x1], 1 }
 0x1d4   :  { %408 = vsyncpa [#allocation4], 1 }
 0x1d5   :  { %410 = vsyncpa [#allocation4 + $0x1], 1 }

</bundles_post_ra>
